<compile_context>
chip_gen: v6e
topology: v6e:2x2x1
jax: 0.10.0
libtpu: 0.0.40
codegen_flags: <defaults>
</compile_context>

<pallas_src>
import math

import jax
import jax.numpy as jnp
from jax.experimental import pallas as pl
from jax.experimental.pallas import tpu as pltpu

NUM_EMBEDDINGS = 10
EMBED_DIM = 16
OUT_DIM = 1
LANES = 128
MAX_TILE_ROWS = 2048  # 2048*128*4 B = 1 MiB/buffer; 3 arrays x 2 bufs = 6 MiB VMEM


def blockchain_kernel(t_src_ref, t_tgt_ref, src_ref, tgt_ref, out_ref):
    """t_src_ref: (10,) f32 in SMEM = emb@W + b;  t_tgt_ref: (10,) f32 = emb@W.
    src_ref / tgt_ref / out_ref: (tile_rows, 128) blocks in VMEM."""
    src = src_ref[...]                                   # (tile_rows, 128) int32
    tgt = tgt_ref[...]

    # 10-entry lookup as an unrolled compare/select chain on the VPU.
    # Initialize with entry 0 (saves 2 cmp + 2 sel per vreg); out-of-range ids
    # therefore map to entry 0's value (nn.Embedding would raise instead).
    src_val = jnp.full(src.shape, t_src_ref[0], jnp.float32)
    tgt_val = jnp.full(tgt.shape, t_tgt_ref[0], jnp.float32)
    for k in range(1, NUM_EMBEDDINGS):
        src_val = jnp.where(src == k, t_src_ref[k], src_val)
        tgt_val = jnp.where(tgt == k, t_tgt_ref[k], tgt_val)

    out_ref[...] = src_val + tgt_val                     # bias already folded in


def blockchain_model(source, target, emb_table, fc_w, fc_b):
    """source, target: integer arrays of identical shape with ids in [0, 10).
    Returns shape (*source.shape, 1), matching Embedding(10,16) + Linear(16,1).
    Out-of-range ids map to entry 0's value instead of erroring."""
    assert source.shape == target.shape
    lead_shape = source.shape
    n = math.prod(lead_shape) if lead_shape else 1

    # Fold the model:  out = (t + b)[src] + t[tgt],  t = emb @ W  (10-vector).
    t = (emb_table.astype(jnp.float32) @ fc_w.astype(jnp.float32)).reshape(
        NUM_EMBEDDINGS)
    t_src = t + fc_b.astype(jnp.float32).reshape(())     # bias folded into src table
    t_tgt = t

    # Lane-dense layout: (rows, 128).  Pad only when n is not a lane multiple.
    rows = pl.cdiv(n, LANES)
    n_lane_padded = rows * LANES

    src_flat = source.reshape(-1).astype(jnp.int32)
    tgt_flat = target.reshape(-1).astype(jnp.int32)
    lane_pad = n_lane_padded - n
    if lane_pad:
        src_flat = jnp.pad(src_flat, (0, lane_pad))      # tiny pad, sliced away below
        tgt_flat = jnp.pad(tgt_flat, (0, lane_pad))
    src2d = src_flat.reshape(rows, LANES)
    tgt2d = tgt_flat.reshape(rows, LANES)

    # Tile selection: big tiles to amortize per-step overhead, but keep >=2 grid
    # steps when possible so the "parallel" axis can feed both v7x TensorCores.
    if rows >= 2 * MAX_TILE_ROWS:
        tile_rows = MAX_TILE_ROWS
    elif rows >= 16:
        tile_rows = min(MAX_TILE_ROWS, ((pl.cdiv(rows, 2) + 7) // 8) * 8)
    else:
        tile_rows = rows                                  # single block == full dim
    grid = (pl.cdiv(rows, tile_rows),)

    out2d = pl.pallas_call(
        blockchain_kernel,
        out_shape=jax.ShapeDtypeStruct((rows, LANES), jnp.float32),
        grid=grid,
        in_specs=[
            pl.BlockSpec(memory_space=pltpu.MemorySpace.SMEM),       # t_src (10,)
            pl.BlockSpec(memory_space=pltpu.MemorySpace.SMEM),       # t_tgt (10,)
            pl.BlockSpec((tile_rows, LANES), lambda i: (i, 0)),      # src ids
            pl.BlockSpec((tile_rows, LANES), lambda i: (i, 0)),      # tgt ids
        ],
        out_specs=pl.BlockSpec((tile_rows, LANES), lambda i: (i, 0)),
        compiler_params=pltpu.CompilerParams(
            dimension_semantics=("parallel",)),
    )(t_src, t_tgt, src2d, tgt2d)

    if lane_pad:
        out = out2d.reshape(-1)[:n]
    else:
        out = out2d.reshape(-1)
    return out.reshape(*lead_shape, OUT_DIM)


def reference_model(source, target, emb_table, fc_w, fc_b):
    src_e = emb_table[source]
    tgt_e = emb_table[target]
    combined = src_e + tgt_e
    return combined @ fc_w + fc_b


if __name__ == "__main__":
    key = jax.random.PRNGKey(0)
    k_emb, k_w, k_b, k_src, k_tgt = jax.random.split(key, 5)

    # Deterministic parameter init (shapes from the PyTorch module __init__).
    emb_table = jax.random.normal(k_emb, (NUM_EMBEDDINGS, EMBED_DIM), jnp.float32)
    fc_w = jax.random.normal(k_w, (EMBED_DIM, OUT_DIM), jnp.float32) * 0.1
    fc_b = jax.random.normal(k_b, (OUT_DIM,), jnp.float32)

    # Small input shapes: batch=2, seq=8 of node ids in [0, 10).
    batch, seq = 2, 8
    source = jax.random.randint(k_src, (batch, seq), 0, NUM_EMBEDDINGS, jnp.int32)
    target = jax.random.randint(k_tgt, (batch, seq), 0, NUM_EMBEDDINGS, jnp.int32)

    out = blockchain_model(source, target, emb_table, fc_w, fc_b)
    out = jax.block_until_ready(out)

    ref = reference_model(source, target, emb_table, fc_w, fc_b)
    assert out.shape == (batch, seq, OUT_DIM), out.shape
    assert jnp.allclose(out, ref, atol=1e-5, rtol=1e-5), "mismatch vs reference"

    print("KERNEL_OK")
</pallas_src>

<mosaic_0001>
module attributes {stable_mosaic.version = 11 : i64} {
  func.func @blockchain_kernel(%arg0: i32, %arg1: memref<10xf32, #tpu.memory_space<smem>>, %arg2: memref<10xf32, #tpu.memory_space<smem>>, %arg3: memref<1x128xi32, #tpu.memory_space<vmem>>, %arg4: memref<1x128xi32, #tpu.memory_space<vmem>>, %arg5: memref<1x128xf32, #tpu.memory_space<vmem>>) attributes {dimension_semantics = [#tpu.dimension_semantics<parallel>], iteration_bounds = array<i64: 1>, scalar_prefetch = 0 : i64, scratch_operands = 0 : i64, tpu.core_type = #tpu.core_type<tc>, window_params = [{transform_indices = @transform_0, window_bounds = array<i64: 10>}, {transform_indices = @transform_1, window_bounds = array<i64: 10>}, {transform_indices = @transform_2, window_bounds = array<i64: 1, 128>}, {transform_indices = @transform_3, window_bounds = array<i64: 1, 128>}, {transform_indices = @transform_4, window_bounds = array<i64: 1, 128>}]} {
    %c0 = arith.constant 0 : index
    %c0_0 = arith.constant 0 : index
    %0 = vector.load %arg3[%c0, %c0_0] : memref<1x128xi32, #tpu.memory_space<vmem>>, vector<1x128xi32>
    %c0_1 = arith.constant 0 : index
    %c0_2 = arith.constant 0 : index
    %1 = vector.load %arg4[%c0_1, %c0_2] : memref<1x128xi32, #tpu.memory_space<vmem>>, vector<1x128xi32>
    %c0_3 = arith.constant 0 : index
    %2 = memref.load %arg1[%c0_3] : memref<10xf32, #tpu.memory_space<smem>>
    %3 = vector.broadcast %2 : f32 to vector<1x128xf32>
    %c0_4 = arith.constant 0 : index
    %4 = memref.load %arg2[%c0_4] : memref<10xf32, #tpu.memory_space<smem>>
    %5 = vector.broadcast %4 : f32 to vector<1x128xf32>
    %c1_i32 = arith.constant 1 : i32
    %6 = vector.broadcast %c1_i32 : i32 to vector<1x128xi32>
    %7 = arith.cmpi eq, %0, %6 : vector<1x128xi32>
    %c1 = arith.constant 1 : index
    %8 = memref.load %arg1[%c1] : memref<10xf32, #tpu.memory_space<smem>>
    %9 = vector.broadcast %8 : f32 to vector<1x128xf32>
    %10 = arith.select %7, %9, %3 : vector<1x128xi1>, vector<1x128xf32>
    %c1_i32_5 = arith.constant 1 : i32
    %11 = vector.broadcast %c1_i32_5 : i32 to vector<1x128xi32>
    %12 = arith.cmpi eq, %1, %11 : vector<1x128xi32>
    %c1_6 = arith.constant 1 : index
    %13 = memref.load %arg2[%c1_6] : memref<10xf32, #tpu.memory_space<smem>>
    %14 = vector.broadcast %13 : f32 to vector<1x128xf32>
    %15 = arith.select %12, %14, %5 : vector<1x128xi1>, vector<1x128xf32>
    %c2_i32 = arith.constant 2 : i32
    %16 = vector.broadcast %c2_i32 : i32 to vector<1x128xi32>
    %17 = arith.cmpi eq, %0, %16 : vector<1x128xi32>
    %c2 = arith.constant 2 : index
    %18 = memref.load %arg1[%c2] : memref<10xf32, #tpu.memory_space<smem>>
    %19 = vector.broadcast %18 : f32 to vector<1x128xf32>
    %20 = arith.select %17, %19, %10 : vector<1x128xi1>, vector<1x128xf32>
    %c2_i32_7 = arith.constant 2 : i32
    %21 = vector.broadcast %c2_i32_7 : i32 to vector<1x128xi32>
    %22 = arith.cmpi eq, %1, %21 : vector<1x128xi32>
    %c2_8 = arith.constant 2 : index
    %23 = memref.load %arg2[%c2_8] : memref<10xf32, #tpu.memory_space<smem>>
    %24 = vector.broadcast %23 : f32 to vector<1x128xf32>
    %25 = arith.select %22, %24, %15 : vector<1x128xi1>, vector<1x128xf32>
    %c3_i32 = arith.constant 3 : i32
    %26 = vector.broadcast %c3_i32 : i32 to vector<1x128xi32>
    %27 = arith.cmpi eq, %0, %26 : vector<1x128xi32>
    %c3 = arith.constant 3 : index
    %28 = memref.load %arg1[%c3] : memref<10xf32, #tpu.memory_space<smem>>
    %29 = vector.broadcast %28 : f32 to vector<1x128xf32>
    %30 = arith.select %27, %29, %20 : vector<1x128xi1>, vector<1x128xf32>
    %c3_i32_9 = arith.constant 3 : i32
    %31 = vector.broadcast %c3_i32_9 : i32 to vector<1x128xi32>
    %32 = arith.cmpi eq, %1, %31 : vector<1x128xi32>
    %c3_10 = arith.constant 3 : index
    %33 = memref.load %arg2[%c3_10] : memref<10xf32, #tpu.memory_space<smem>>
    %34 = vector.broadcast %33 : f32 to vector<1x128xf32>
    %35 = arith.select %32, %34, %25 : vector<1x128xi1>, vector<1x128xf32>
    %c4_i32 = arith.constant 4 : i32
    %36 = vector.broadcast %c4_i32 : i32 to vector<1x128xi32>
    %37 = arith.cmpi eq, %0, %36 : vector<1x128xi32>
    %c4 = arith.constant 4 : index
    %38 = memref.load %arg1[%c4] : memref<10xf32, #tpu.memory_space<smem>>
    %39 = vector.broadcast %38 : f32 to vector<1x128xf32>
    %40 = arith.select %37, %39, %30 : vector<1x128xi1>, vector<1x128xf32>
    %c4_i32_11 = arith.constant 4 : i32
    %41 = vector.broadcast %c4_i32_11 : i32 to vector<1x128xi32>
    %42 = arith.cmpi eq, %1, %41 : vector<1x128xi32>
    %c4_12 = arith.constant 4 : index
    %43 = memref.load %arg2[%c4_12] : memref<10xf32, #tpu.memory_space<smem>>
    %44 = vector.broadcast %43 : f32 to vector<1x128xf32>
    %45 = arith.select %42, %44, %35 : vector<1x128xi1>, vector<1x128xf32>
    %c5_i32 = arith.constant 5 : i32
    %46 = vector.broadcast %c5_i32 : i32 to vector<1x128xi32>
    %47 = arith.cmpi eq, %0, %46 : vector<1x128xi32>
    %c5 = arith.constant 5 : index
    %48 = memref.load %arg1[%c5] : memref<10xf32, #tpu.memory_space<smem>>
    %49 = vector.broadcast %48 : f32 to vector<1x128xf32>
    %50 = arith.select %47, %49, %40 : vector<1x128xi1>, vector<1x128xf32>
    %c5_i32_13 = arith.constant 5 : i32
    %51 = vector.broadcast %c5_i32_13 : i32 to vector<1x128xi32>
    %52 = arith.cmpi eq, %1, %51 : vector<1x128xi32>
    %c5_14 = arith.constant 5 : index
    %53 = memref.load %arg2[%c5_14] : memref<10xf32, #tpu.memory_space<smem>>
    %54 = vector.broadcast %53 : f32 to vector<1x128xf32>
    %55 = arith.select %52, %54, %45 : vector<1x128xi1>, vector<1x128xf32>
    %c6_i32 = arith.constant 6 : i32
    %56 = vector.broadcast %c6_i32 : i32 to vector<1x128xi32>
    %57 = arith.cmpi eq, %0, %56 : vector<1x128xi32>
    %c6 = arith.constant 6 : index
    %58 = memref.load %arg1[%c6] : memref<10xf32, #tpu.memory_space<smem>>
    %59 = vector.broadcast %58 : f32 to vector<1x128xf32>
    %60 = arith.select %57, %59, %50 : vector<1x128xi1>, vector<1x128xf32>
    %c6_i32_15 = arith.constant 6 : i32
    %61 = vector.broadcast %c6_i32_15 : i32 to vector<1x128xi32>
    %62 = arith.cmpi eq, %1, %61 : vector<1x128xi32>
    %c6_16 = arith.constant 6 : index
    %63 = memref.load %arg2[%c6_16] : memref<10xf32, #tpu.memory_space<smem>>
    %64 = vector.broadcast %63 : f32 to vector<1x128xf32>
    %65 = arith.select %62, %64, %55 : vector<1x128xi1>, vector<1x128xf32>
    %c7_i32 = arith.constant 7 : i32
    %66 = vector.broadcast %c7_i32 : i32 to vector<1x128xi32>
    %67 = arith.cmpi eq, %0, %66 : vector<1x128xi32>
    %c7 = arith.constant 7 : index
    %68 = memref.load %arg1[%c7] : memref<10xf32, #tpu.memory_space<smem>>
    %69 = vector.broadcast %68 : f32 to vector<1x128xf32>
    %70 = arith.select %67, %69, %60 : vector<1x128xi1>, vector<1x128xf32>
    %c7_i32_17 = arith.constant 7 : i32
    %71 = vector.broadcast %c7_i32_17 : i32 to vector<1x128xi32>
    %72 = arith.cmpi eq, %1, %71 : vector<1x128xi32>
    %c7_18 = arith.constant 7 : index
    %73 = memref.load %arg2[%c7_18] : memref<10xf32, #tpu.memory_space<smem>>
    %74 = vector.broadcast %73 : f32 to vector<1x128xf32>
    %75 = arith.select %72, %74, %65 : vector<1x128xi1>, vector<1x128xf32>
    %c8_i32 = arith.constant 8 : i32
    %76 = vector.broadcast %c8_i32 : i32 to vector<1x128xi32>
    %77 = arith.cmpi eq, %0, %76 : vector<1x128xi32>
    %c8 = arith.constant 8 : index
    %78 = memref.load %arg1[%c8] : memref<10xf32, #tpu.memory_space<smem>>
    %79 = vector.broadcast %78 : f32 to vector<1x128xf32>
    %80 = arith.select %77, %79, %70 : vector<1x128xi1>, vector<1x128xf32>
    %c8_i32_19 = arith.constant 8 : i32
    %81 = vector.broadcast %c8_i32_19 : i32 to vector<1x128xi32>
    %82 = arith.cmpi eq, %1, %81 : vector<1x128xi32>
    %c8_20 = arith.constant 8 : index
    %83 = memref.load %arg2[%c8_20] : memref<10xf32, #tpu.memory_space<smem>>
    %84 = vector.broadcast %83 : f32 to vector<1x128xf32>
    %85 = arith.select %82, %84, %75 : vector<1x128xi1>, vector<1x128xf32>
    %c9_i32 = arith.constant 9 : i32
    %86 = vector.broadcast %c9_i32 : i32 to vector<1x128xi32>
    %87 = arith.cmpi eq, %0, %86 : vector<1x128xi32>
    %c9 = arith.constant 9 : index
    %88 = memref.load %arg1[%c9] : memref<10xf32, #tpu.memory_space<smem>>
    %89 = vector.broadcast %88 : f32 to vector<1x128xf32>
    %90 = arith.select %87, %89, %80 : vector<1x128xi1>, vector<1x128xf32>
    %c9_i32_21 = arith.constant 9 : i32
    %91 = vector.broadcast %c9_i32_21 : i32 to vector<1x128xi32>
    %92 = arith.cmpi eq, %1, %91 : vector<1x128xi32>
    %c9_22 = arith.constant 9 : index
    %93 = memref.load %arg2[%c9_22] : memref<10xf32, #tpu.memory_space<smem>>
    %94 = vector.broadcast %93 : f32 to vector<1x128xf32>
    %95 = arith.select %92, %94, %85 : vector<1x128xi1>, vector<1x128xf32>
    %96 = arith.addf %90, %95 : vector<1x128xf32>
    %c0_23 = arith.constant 0 : index
    %c0_24 = arith.constant 0 : index
    %97 = vector.load %arg5[%c0_23, %c0_24] : memref<1x128xf32, #tpu.memory_space<vmem>>, vector<1x128xf32>
    tpu.vector_store %arg5[%c0_23, %c0_24], %96 {strides = array<i32>} : memref<1x128xf32, #tpu.memory_space<vmem>>, vector<1x128xf32>,
    return
  }
  func.func @transform_0(%arg0: i32) -> i32 {
    %c0_i32 = arith.constant 0 : i32
    %c0_i32_0 = arith.constant 0 : i32
    return %c0_i32 : i32
  }
  func.func @transform_1(%arg0: i32) -> i32 {
    %c0_i32 = arith.constant 0 : i32
    %c0_i32_0 = arith.constant 0 : i32
    return %c0_i32 : i32
  }
  func.func @transform_2(%arg0: i32) -> (i32, i32) {
    %c0_i32 = arith.constant 0 : i32
    %c0_i32_0 = arith.constant 0 : i32
    return %arg0, %c0_i32 : i32, i32
  }
  func.func @transform_3(%arg0: i32) -> (i32, i32) {
    %c0_i32 = arith.constant 0 : i32
    %c0_i32_0 = arith.constant 0 : i32
    return %arg0, %c0_i32 : i32, i32
  }
  func.func @transform_4(%arg0: i32) -> (i32, i32) {
    %c0_i32 = arith.constant 0 : i32
    %c0_i32_0 = arith.constant 0 : i32
    return %arg0, %c0_i32 : i32, i32
  }
}

</mosaic_0001>

<bundles_post_ra>
// kernel: tpu_custom_call.1
= control target key start
LH: loop header
LB: loop body
LE: loop exit
PB: predicated region body
PF: predicated region fallthrough
CT: control target
= control target key end

     0   :  { %9 = vsyncpa [#allocation4], 0  ;;  %s269_s0 = inlined_call_operand.hbm [shape: f32[10], index: 0, kind: input, shape index: {}]   ;;  %s270_s1 = inlined_call_operand.vmem [shape: f32[10], index: 1, kind: input, shape index: {}]   ;;  %s271_s2 = inlined_call_operand.vmem [shape: s32[1,128], index: 2, kind: input, shape index: {}]   ;;  %s272_s3 = inlined_call_operand.vmem [shape: s32[1,128], index: 3, kind: input, shape index: {}]   ;;  %s273_s4 = inlined_call_operand.hbm [shape: f32[1,128], index: 4, kind: output, shape index: {}]  }
   0x1   :  { %10 = vsyncpa [#allocation5], 0 }
   0x2   :  { %11 = vsyncpa [#allocation3], 0  ;;  %s26_s17 = sshll.u32 %s270_s1, 4  ;;  %s204_s18 = smov [#allocation2]   ;;  %s27_s17 = int_to_ptr.vmem [resolvable:$true] %s26_s17 }
   0x3   :  { %19 = dma.hbm_to_smem %s269_s0, 16, %s204_s18, [#allocation4]  }
   0x4   :  { %s166_s21 = scalar_lea.vmem %s27_s17, 16  ;;  %p171_p1 = scmp.lt.s32.totalorder %s27_s17, %s27_s17 }
   0x5   :  { %p167_p0 = scmp.ne.s32.totalorder %s27_s17, %s166_s21  ;;  %p172_p2 = scmp.lt.s32.totalorder %s166_s21, %s166_s21 }
   0x7   :  { %p173_p3 = por %p172_p2, %p171_p1 }
   0x9   :  { %p174_p4 = pnand %p173_p3, %p167_p0 }
   0xb   :  { %177 = shalt.err (!%p174_p4)
}
   0xc   :  { %s205_s22 = smov [#allocation6]  }
   0xd   :  { %29 = dma.vmem_to_smem %s27_s17, 16, %s205_s22, [#allocation5]  }
   0xe   :  { %198 = dma.done.wait [#allocation4], 16  }
   0xf   :  { %199 = vsyncadd [#allocation4], 4294967280 }
  0x10   :  { %200 = dma.done.wait [#allocation5], 16  }
  0x11   :  { %201 = vsyncadd [#allocation5], 4294967280 }
  0x12   :  { %40 = sfence }
  0x13   :  { %s43_s1 = sld [smem:[#allocation2]]  ;;  %v241_v0 = vld [vmem:[%s271_s2] sm:$0x1]  ;;  %s206_s17 = smov [#allocation7]  }
  0x14   :  { %s45_s23 = sld [smem:[#allocation6]]  ;;  %v246_v1 = vld [vmem:[%s272_s3] sm:$0x1]  ;;  %vm47_vm0 = vcmp.eq.s32.totalorder %v241_v0, 1  ;;  %vm55_vm2 = vcmp.eq.s32.totalorder %v241_v0, 2  ;;  %vm63_vm4 = vcmp.eq.s32.totalorder %v241_v0, 3 }
  0x15   :  { %s137_s24 = sld [smem:[#allocation2 + $0x1]]  ;;  %vm51_vm1 = vcmp.eq.s32.totalorder %v246_v1, 1  ;;  %vm59_vm3 = vcmp.eq.s32.totalorder %v246_v1, 2  ;;  %vm67_vm5 = vcmp.eq.s32.totalorder %v246_v1, 3  ;;  %vm71_vm6 = vcmp.eq.s32.totalorder %v241_v0, 4  ;;  %s127_s18 = sshll.u32 %s206_s17, 4  ;;  %s128_s18 = int_to_ptr.vmem [resolvable:$true] %s127_s18 }
  0x16   :  { %s138_s26 = sld [smem:[#allocation6 + $0x1]]  ;;  %vm75_vm7 = vcmp.eq.s32.totalorder %v246_v1, 4  ;;  %vm79_vm8 = vcmp.eq.s32.totalorder %v241_v0, 5  ;;  %vm83_vm9 = vcmp.eq.s32.totalorder %v246_v1, 5  ;;  %vm87_vm10 = vcmp.eq.s32.totalorder %v241_v0, 6  ;;  %s178_s19 = scalar_lea.vmem %s128_s18, 16 }
  0x17   :  { %s139_s29 = sld [smem:[#allocation2 + $0x2]]  ;;  %vm91_vm11 = vcmp.eq.s32.totalorder %v246_v1, 6  ;;  %vm95_vm12 = vcmp.eq.s32.totalorder %v241_v0, 7  ;;  %vm99_vm13 = vcmp.eq.s32.totalorder %v246_v1, 7  ;;  %vm103_vm14 = vcmp.eq.s32.totalorder %v241_v0, 8  ;;  %p179_p5 = scmp.ne.s32.totalorder %s128_s18, %s178_s19 }
  0x18   :  { %s140_s30 = sld [smem:[#allocation6 + $0x2]]  ;;  %vm107_vm15 = vcmp.eq.s32.totalorder %v246_v1, 8  ;;  %s182_s20 = scalar_lea.vmem %s128_s18, 32 }
  0x19   :  { %v44_v2 = vstv %s43_s1  ;;  %s141_s5 = sld [smem:[#allocation2 + $0x3]]  ;;  %p183_p6 = scmp.lt.s32.totalorder %s128_s18, %s128_s18 }
  0x1a   :  { %v46_v3 = vstv %s45_s23  ;;  %s142_s6 = sld [smem:[#allocation6 + $0x3]]  ;;  %p184_p7 = scmp.lt.s32.totalorder %s182_s20, %s178_s19 }
  0x1b   :  { %v49_v4 = vstv %s137_s24  ;;  %s143_s2 = sld [smem:[#allocation2 + $0x4]] }
  0x1c   :  { %v50_v5 = vsel %vm47_vm0, %v49_v4, %v44_v2  ;;  %v53_v6 = vstv %s138_s26  ;;  %s144_s3 = sld [smem:[#allocation6 + $0x4]]  ;;  %vm111_vm0 = vcmp.eq.s32.totalorder %v241_v0, 9  ;;  %p185_p8 = por %p184_p7, %p183_p6 }
  0x1d   :  { %v54_v7 = vsel %vm51_vm1, %v53_v6, %v46_v3  ;;  %v57_v8 = vstv %s139_s29  ;;  %s145_s7 = sld [smem:[#allocation2 + $0x5]]  ;;  %vm115_vm1 = vcmp.eq.s32.totalorder %v246_v1, 9 }
  0x1e   :  { %v58_v9 = vsel %vm55_vm2, %v57_v8, %v50_v5  ;;  %v61_v10 = vstv %s140_s30  ;;  %s146_s8 = sld [smem:[#allocation6 + $0x5]]  ;;  %p186_p9 = pnand %p185_p8, %p179_p5 }
  0x1f   :  { %v62_v11 = vsel %vm59_vm3, %v61_v10, %v54_v7  ;;  %v65_v12 = vstv %s141_s5  ;;  %s147_s9 = sld [smem:[#allocation2 + $0x6]] }
  0x20   :  { %v66_v13 = vsel %vm63_vm4, %v65_v12, %v58_v9  ;;  %v69_v14 = vstv %s142_s6  ;;  %s148_s10 = sld [smem:[#allocation6 + $0x6]] }
  0x21   :  { %v70_v15 = vsel %vm67_vm5, %v69_v14, %v62_v11  ;;  %v73_v16 = vstv %s143_s2  ;;  %s149_s11 = sld [smem:[#allocation2 + $0x7]] }
  0x22   :  { %v74_v17 = vsel %vm71_vm6, %v73_v16, %v66_v13  ;;  %v77_v18 = vstv %s144_s3  ;;  %s150_s12 = sld [smem:[#allocation6 + $0x7]] }
  0x23   :  { %v78_v19 = vsel %vm75_vm7, %v77_v18, %v70_v15  ;;  %v81_v20 = vstv %s145_s7  ;;  %s151_s13 = sld [smem:[#allocation2 + $0x8]] }
  0x24   :  { %v82_v21 = vsel %vm79_vm8, %v81_v20, %v74_v17  ;;  %v85_v22 = vstv %s146_s8  ;;  %s152_s14 = sld [smem:[#allocation6 + $0x8]] }
  0x25   :  { %v86_v23 = vsel %vm83_vm9, %v85_v22, %v78_v19  ;;  %v89_v24 = vstv %s147_s9  ;;  %s153_s15 = sld [smem:[#allocation2 + $0x9]] }
  0x26   :  { %v90_v25 = vsel %vm87_vm10, %v89_v24, %v82_v21  ;;  %v93_v26 = vstv %s148_s10  ;;  %s154_s16 = sld [smem:[#allocation6 + $0x9]] }
  0x27   :  { %v94_v27 = vsel %vm91_vm11, %v93_v26, %v86_v23  ;;  %v97_v28 = vstv %s149_s11 }
  0x28   :  { %v98_v29 = vsel %vm95_vm12, %v97_v28, %v90_v25  ;;  %v101_v30 = vstv %s150_s12 }
  0x29   :  { %v102_v31 = vsel %vm99_vm13, %v101_v30, %v94_v27  ;;  %v105_v32 = vstv %s151_s13 }
  0x2a   :  { %v106_v33 = vsel %vm103_vm14, %v105_v32, %v98_v29  ;;  %v109_v34 = vstv %s152_s14 }
  0x2b   :  { %v110_v35 = vsel %vm107_vm15, %v109_v34, %v102_v31  ;;  %v113_v36 = vstv %s153_s15 }
  0x2c   :  { %v114_v37 = vsel %vm111_vm0, %v113_v36, %v106_v33  ;;  %v117_v38 = vstv %s154_s16 }
  0x2d   :  { %v118_v39 = vsel %vm115_vm1, %v117_v38, %v110_v35 }
  0x2e   :  { %v119_v40 = vadd.f32 %v118_v39, %v114_v37 }
  0x30   :  { %120 = vst [vmem:[#allocation7] sm:$0x1] %v119_v40 }
  0x31   :  { %189 = shalt.err (!%p186_p9)
}
  0x32   :  { %130 = dma.vmem_to_hbm [thread:$0]  %s128_s18, 16, %s273_s4, [#allocation3]  }
  0x33   :  { %202 = dma.done.wait [#allocation3], 16  }
  0x34   :  { %203 = vsyncadd [#allocation3], 4294967280 }
  0x35   :  { %134 = vsyncpa [#allocation3], 1 }
  0x36   :  { %135 = vsyncpa [#allocation4], 1 }
  0x37   :  { %136 = vsyncpa [#allocation5], 1 }

</bundles_post_ra>
